<compile_context>
chip_gen: v5e
topology: v5e:2x2
jax: 0.10.0
libtpu: 0.0.40
codegen_flags: <defaults>
</compile_context>

<pallas_src>
import math
import jax
import jax.numpy as jnp
from jax.experimental import pallas as pl
from jax.experimental.pallas import tpu as pltpu

FEATURE_SIZE = 16
D_MODEL = FEATURE_SIZE // 2        # transformer d_model == auto_hidden == 8
FF_DIM = 32                        # Net(hidden_dim=32) -> dim_feedforward
EPS = 1e-5                         # nn.LayerNorm default eps
NOISE_LEVEL = 0.0                  # module-global noise_level = 0.0 -> mask() is identity
# TODO(synk): noise_level > 0 would need pltpu.prng_* gaussian noise in-kernel.
# TODO(synk): dropout is 0.0 here; training-mode dropout is not implemented.


def _col_layernorm(x):
    """LayerNorm over the feature axis (sublanes); each batch column (lane) independent."""
    mu = jnp.mean(x, axis=0, keepdims=True)
    var = jnp.mean((x - mu) ** 2, axis=0, keepdims=True)
    return (x - mu) * jax.lax.rsqrt(var + EPS)


def net_kernel(x_ref,
               w1_ref, b1_ref,
               wcomb_ref, b2_ref, c_ref,
               g1_ref, be1_ref,
               wf1_ref, bf1_ref, wf2_ref, bf2_ref,
               wl_ref, bl_ref,
               out_ref, dec_ref):
    x = x_ref[...]                                            # (TB, 16) batch-major

    # --- Autoencoder fc1 + ReLU (noise_level == 0.0 -> corrupted_x == x) ---
    # Contraction over both minors (the q@k^T MXU pattern): no input transpose
    # is ever materialized; the result lands feature-major (8, TB).
    enc = jnp.maximum(
        jax.lax.dot_general(w1_ref[...], x, (((1,), (1,)), ((), ())),
                            preferred_element_type=jnp.float32)
        + b1_ref[...], 0.0)                                   # (8, TB)

    # --- fc2 and collapsed attention share the `enc` stream ---
    # seq_len == 1 -> softmax == 1 -> MHA == out_proj(v_proj(.)); residual
    # folded: W_res = I + Wo@Wv.  wcomb = [W2 ; W_res] is (24, 8).
    comb = jnp.dot(wcomb_ref[...], enc,
                   preferred_element_type=jnp.float32)        # (24, TB)

    dec_fm = comb[0:FEATURE_SIZE, :] + b2_ref[...]            # (16, TB) decoder output
    dec_ref[...] = jnp.transpose(dec_fm)                      # (TB, 16) batch-major store

    # t = norm1(t0 + attn(t0)) with t0 = enc + pe; algebraically
    #     t0 + attn(t0) = W_res @ enc + c,  c = W_res @ pe + b_attn   (exact).
    t = (_col_layernorm(comb[FEATURE_SIZE:, :] + c_ref[...])
         * g1_ref[...] + be1_ref[...])                        # (8, TB)

    # --- Feed-forward block (ReLU), post-norm; norm2 affine folded into wl/bl ---
    h = jnp.maximum(
        jnp.dot(wf1_ref[...], t, preferred_element_type=jnp.float32)
        + bf1_ref[...], 0.0)                                  # (32, TB)
    ff = (jnp.dot(wf2_ref[...], h, preferred_element_type=jnp.float32)
          + bf2_ref[...])                                     # (8, TB)
    t = _col_layernorm(t + ff)

    # --- Final Linear(8 -> 1): VPU multiply + sublane reduction (no 1-row MXU matmul) ---
    out_ref[...] = (jnp.sum(t * wl_ref[...], axis=0, keepdims=True)
                    + bl_ref[...])                            # (1, TB)


def positional_encoding(d_model, max_len):
    position = jnp.arange(max_len, dtype=jnp.float32)[:, None]
    div_term = jnp.exp(jnp.arange(0, d_model, 2, dtype=jnp.float32)
                       * (-math.log(10000.0) / d_model))
    pe = jnp.zeros((max_len, d_model), jnp.float32)
    pe = pe.at[:, 0::2].set(jnp.sin(position * div_term))
    pe = pe.at[:, 1::2].set(jnp.cos(position * div_term))
    return pe


def make_params(key):
    ks = jax.random.split(key, 7)

    def linear(k, out_d, in_d):
        # PyTorch-style uniform(-1/sqrt(fan_in), 1/sqrt(fan_in))
        bound = 1.0 / math.sqrt(in_d)
        kw, kb = jax.random.split(k)
        w = jax.random.uniform(kw, (out_d, in_d), jnp.float32, -bound, bound)
        b = jax.random.uniform(kb, (out_d,), jnp.float32, -bound, bound)
        return w, b

    p = {}
    p['w1'], p['b1'] = linear(ks[0], D_MODEL, FEATURE_SIZE)    # autoencoder.fc1
    p['w2'], p['b2'] = linear(ks[1], FEATURE_SIZE, D_MODEL)    # autoencoder.fc2
    p['wv'], p['bv'] = linear(ks[2], D_MODEL, D_MODEL)         # V slice of in_proj
    p['wo'], p['bo'] = linear(ks[3], D_MODEL, D_MODEL)         # attn out_proj
    p['wf1'], p['bf1'] = linear(ks[4], FF_DIM, D_MODEL)        # linear1
    p['wf2'], p['bf2'] = linear(ks[5], D_MODEL, FF_DIM)        # linear2
    p['g1'] = jnp.ones((D_MODEL,), jnp.float32)                # norm1
    p['be1'] = jnp.zeros((D_MODEL,), jnp.float32)
    p['g2'] = jnp.ones((D_MODEL,), jnp.float32)                # norm2
    p['be2'] = jnp.zeros((D_MODEL,), jnp.float32)
    p['wl'], p['bl'] = linear(ks[6], 1, D_MODEL)               # final linear
    return p


def _round_up(n, m):
    return ((n + m - 1) // m) * m


def _pick_batch_tile(B):
    # Lane-dense tiles (multiple of 128).  Per-grid-step cost is ~0.35 us, so
    # big tiles win for this HBM-bound kernel; 16384 lanes keeps the whole
    # working set (pipelined I/O buffers + intermediates) comfortably under
    # even v7x's 64 MiB VMEM.  Use >= 2 grid steps whenever possible so v7x's
    # two TensorCores both get a share of the ("parallel") batch axis.
    tb = _round_up(max(-(-B // 2), 128), 128)
    return min(tb, 16384, _round_up(B, 128))


def net_forward(x, params):
    B = x.shape[0]
    xf = x.reshape(B, -1).astype(jnp.float32)                  # (B, 16), free view

    TB = _pick_batch_tile(B)
    Bp = B
    if B < TB:                     # tiny batches: cheap pad up to one tile;
        Bp = TB                    # large ragged batches instead rely on
        xf = jnp.pad(xf, ((0, TB - B), (0, 0)))   # Pallas partial-block masking.

    col = lambda v: jnp.asarray(v, jnp.float32).reshape(-1, 1)

    # --- trace-time algebraic folds (exact for seq_len==1, dropout==0) ---
    pe_row = positional_encoding(D_MODEL, D_MODEL)[0]          # (8,)  only row 0 used
    w_attn = params['wo'] @ params['wv']                       # MHA collapse (8, 8)
    b_attn = params['wo'] @ params['bv'] + params['bo']        # (8,)
    w_res = jnp.eye(D_MODEL, dtype=jnp.float32) + w_attn       # attention residual fold
    c_vec = w_res @ pe_row + b_attn                            # PE + attn-bias fold (8,)
    w_comb = jnp.concatenate([params['w2'], w_res], axis=0)    # (24, 8): [fc2 ; attn]
    wl_eff = params['wl'] * params['g2'][None, :]              # (1, 8) norm2 gamma fold
    bl_eff = params['bl'] + params['wl'] @ params['be2']       # (1,)   norm2 beta fold

    weights = (
        params['w1'].astype(jnp.float32), col(params['b1']),
        w_comb, col(params['b2']), col(c_vec),
        col(params['g1']), col(params['be1']),
        params['wf1'].astype(jnp.float32), col(params['bf1']),
        params['wf2'].astype(jnp.float32), col(params['bf2']),
        col(wl_eff), jnp.asarray(bl_eff, jnp.float32).reshape(1, 1),
    )

    grid = (pl.cdiv(Bp, TB),)
    const_spec = lambda w: pl.BlockSpec(w.shape, lambda i: (0, 0))
    in_specs = ([pl.BlockSpec((TB, FEATURE_SIZE), lambda i: (i, 0))]
                + [const_spec(w) for w in weights])
    out_specs = (pl.BlockSpec((1, TB), lambda i: (0, i)),
                 pl.BlockSpec((TB, FEATURE_SIZE), lambda i: (i, 0)))

    out_fm, dec = pl.pallas_call(
        net_kernel,
        out_shape=(jax.ShapeDtypeStruct((1, Bp), jnp.float32),
                   jax.ShapeDtypeStruct((Bp, FEATURE_SIZE), jnp.float32)),
        grid=grid,
        in_specs=in_specs,
        out_specs=out_specs,
        compiler_params=pltpu.CompilerParams(
            dimension_semantics=("parallel",),
            vmem_limit_bytes=48 * 1024 * 1024),
    )(xf, *weights)

    out = out_fm[:, :B].reshape(B, 1)    # (1, B) -> (B, 1): same linear layout, free
    decode = dec[:B]                     # no-op unless the tiny-batch pad was used
    return out, decode


if __name__ == "__main__":
    key = jax.random.PRNGKey(0)
    kx, kp = jax.random.split(key)

    B = 2
    # x: (batch, feature_num=1, feature_size=16) — reshape(B, -1) must give 16
    # columns so autoencoder.fc1 (Linear(16, 8)) applies, as in the PyTorch module.
    x = jax.random.normal(kx, (B, 1, FEATURE_SIZE), jnp.float32)
    params = make_params(kp)

    out, decode = jax.jit(net_forward)(x, params)
    jax.block_until_ready((out, decode))

    assert out.shape == (B, 1), out.shape
    assert decode.shape == (B, FEATURE_SIZE), decode.shape
    print("KERNEL_OK")
</pallas_src>

<mosaic_0001>
module attributes {stable_mosaic.version = 11 : i64} {
  func.func @net_kernel(%arg0: i32, %arg1: memref<128x16xf32, #tpu.memory_space<vmem>>, %arg2: memref<8x16xf32, #tpu.memory_space<vmem>>, %arg3: memref<8x1xf32, #tpu.memory_space<vmem>>, %arg4: memref<24x8xf32, #tpu.memory_space<vmem>>, %arg5: memref<16x1xf32, #tpu.memory_space<vmem>>, %arg6: memref<8x1xf32, #tpu.memory_space<vmem>>, %arg7: memref<8x1xf32, #tpu.memory_space<vmem>>, %arg8: memref<8x1xf32, #tpu.memory_space<vmem>>, %arg9: memref<32x8xf32, #tpu.memory_space<vmem>>, %arg10: memref<32x1xf32, #tpu.memory_space<vmem>>, %arg11: memref<8x32xf32, #tpu.memory_space<vmem>>, %arg12: memref<8x1xf32, #tpu.memory_space<vmem>>, %arg13: memref<8x1xf32, #tpu.memory_space<vmem>>, %arg14: memref<1x1xf32, #tpu.memory_space<vmem>>, %arg15: memref<1x128xf32, #tpu.memory_space<vmem>>, %arg16: memref<128x16xf32, #tpu.memory_space<vmem>>) attributes {dimension_semantics = [#tpu.dimension_semantics<parallel>], iteration_bounds = array<i64: 1>, scalar_prefetch = 0 : i64, scratch_operands = 0 : i64, tpu.core_type = #tpu.core_type<tc>, window_params = [{transform_indices = @transform_0, window_bounds = array<i64: 128, 16>}, {pipeline_mode = #tpu.pipeline_mode<synchronous>, transform_indices = @transform_1, window_bounds = array<i64: 8, 16>}, {pipeline_mode = #tpu.pipeline_mode<synchronous>, transform_indices = @transform_2, window_bounds = array<i64: 8, 1>}, {pipeline_mode = #tpu.pipeline_mode<synchronous>, transform_indices = @transform_3, window_bounds = array<i64: 24, 8>}, {pipeline_mode = #tpu.pipeline_mode<synchronous>, transform_indices = @transform_4, window_bounds = array<i64: 16, 1>}, {pipeline_mode = #tpu.pipeline_mode<synchronous>, transform_indices = @transform_5, window_bounds = array<i64: 8, 1>}, {pipeline_mode = #tpu.pipeline_mode<synchronous>, transform_indices = @transform_6, window_bounds = array<i64: 8, 1>}, {pipeline_mode = #tpu.pipeline_mode<synchronous>, transform_indices = @transform_7, window_bounds = array<i64: 8, 1>}, {pipeline_mode = #tpu.pipeline_mode<synchronous>, transform_indices = @transform_8, window_bounds = array<i64: 32, 8>}, {pipeline_mode = #tpu.pipeline_mode<synchronous>, transform_indices = @transform_9, window_bounds = array<i64: 32, 1>}, {pipeline_mode = #tpu.pipeline_mode<synchronous>, transform_indices = @transform_10, window_bounds = array<i64: 8, 32>}, {pipeline_mode = #tpu.pipeline_mode<synchronous>, transform_indices = @transform_11, window_bounds = array<i64: 8, 1>}, {pipeline_mode = #tpu.pipeline_mode<synchronous>, transform_indices = @transform_12, window_bounds = array<i64: 8, 1>}, {pipeline_mode = #tpu.pipeline_mode<synchronous>, transform_indices = @transform_13, window_bounds = array<i64: 1, 1>}, {transform_indices = @transform_14, window_bounds = array<i64: 1, 128>}, {transform_indices = @transform_15, window_bounds = array<i64: 128, 16>}]} {
    %c0 = arith.constant 0 : index
    %c0_0 = arith.constant 0 : index
    %0 = vector.load %arg1[%c0, %c0_0] : memref<128x16xf32, #tpu.memory_space<vmem>>, vector<128x16xf32>
    %c0_1 = arith.constant 0 : index
    %c0_2 = arith.constant 0 : index
    %1 = vector.load %arg2[%c0_1, %c0_2] : memref<8x16xf32, #tpu.memory_space<vmem>>, vector<8x16xf32>
    %cst = arith.constant dense<0.000000e+00> : vector<8x128xf32>
    %2 = tpu.matmul %1, %0, %cst {dimension_numbers = #tpu.dot_dimension_numbers<[1], [1], [0], [0], [0, 0, 1, 0], [], []>} : vector<8x16xf32>, vector<128x16xf32>, vector<8x128xf32> -> vector<8x128xf32>
    %c0_3 = arith.constant 0 : index
    %c0_4 = arith.constant 0 : index
    %3 = vector.load %arg3[%c0_3, %c0_4] : memref<8x1xf32, #tpu.memory_space<vmem>>, vector<8x1xf32>
    %4 = vector.broadcast %3 : vector<8x1xf32> to vector<8x128xf32>
    %5 = arith.addf %2, %4 : vector<8x128xf32>
    %cst_5 = arith.constant 0.000000e+00 : f32
    %6 = vector.broadcast %cst_5 : f32 to vector<8x128xf32>
    %7 = arith.maximumf %5, %6 : vector<8x128xf32>
    %c0_6 = arith.constant 0 : index
    %c0_7 = arith.constant 0 : index
    %8 = vector.load %arg4[%c0_6, %c0_7] : memref<24x8xf32, #tpu.memory_space<vmem>>, vector<24x8xf32>
    %cst_8 = arith.constant dense<0.000000e+00> : vector<24x128xf32>
    %9 = tpu.matmul %8, %7, %cst_8 {dimension_numbers = #tpu.dot_dimension_numbers<[1], [0], [0], [1], [0, 0, 1, 1], [], []>} : vector<24x8xf32>, vector<8x128xf32>, vector<24x128xf32> -> vector<24x128xf32>
    %10 = vector.extract_strided_slice %9 {offsets = [0, 0], sizes = [16, 128], strides = [1, 1]} : vector<24x128xf32> to vector<16x128xf32>
    %c0_9 = arith.constant 0 : index
    %c0_10 = arith.constant 0 : index
    %11 = vector.load %arg5[%c0_9, %c0_10] : memref<16x1xf32, #tpu.memory_space<vmem>>, vector<16x1xf32>
    %12 = vector.broadcast %11 : vector<16x1xf32> to vector<16x128xf32>
    %13 = arith.addf %10, %12 : vector<16x128xf32>
    %14 = tpu.transpose %13, [1, 0] : vector<16x128xf32> -> vector<128x16xf32>
    %c0_11 = arith.constant 0 : index
    %c0_12 = arith.constant 0 : index
    %15 = vector.load %arg16[%c0_11, %c0_12] : memref<128x16xf32, #tpu.memory_space<vmem>>, vector<128x16xf32>
    tpu.vector_store %arg16[%c0_11, %c0_12], %14 {strides = array<i32>} : memref<128x16xf32, #tpu.memory_space<vmem>>, vector<128x16xf32>,
    %16 = vector.extract_strided_slice %9 {offsets = [16, 0], sizes = [8, 128], strides = [1, 1]} : vector<24x128xf32> to vector<8x128xf32>
    %c0_13 = arith.constant 0 : index
    %c0_14 = arith.constant 0 : index
    %17 = vector.load %arg6[%c0_13, %c0_14] : memref<8x1xf32, #tpu.memory_space<vmem>>, vector<8x1xf32>
    %18 = vector.broadcast %17 : vector<8x1xf32> to vector<8x128xf32>
    %19 = arith.addf %16, %18 : vector<8x128xf32>
    %cst_15 = arith.constant dense<0.000000e+00> : vector<128xf32>
    %20 = vector.multi_reduction <add>, %19, %cst_15 [0] : vector<8x128xf32> to vector<128xf32>
    %21 = vector.shape_cast %20 : vector<128xf32> to vector<1x128xf32>
    %cst_16 = arith.constant 8.000000e+00 : f32
    %22 = vector.broadcast %cst_16 : f32 to vector<1x128xf32>
    %23 = arith.divf %21, %22 : vector<1x128xf32>
    %24 = vector.broadcast %23 : vector<1x128xf32> to vector<8x128xf32>
    %25 = arith.subf %19, %24 : vector<8x128xf32>
    %26 = arith.mulf %25, %25 : vector<8x128xf32>
    %cst_17 = arith.constant dense<0.000000e+00> : vector<128xf32>
    %27 = vector.multi_reduction <add>, %26, %cst_17 [0] : vector<8x128xf32> to vector<128xf32>
    %28 = vector.shape_cast %27 : vector<128xf32> to vector<1x128xf32>
    %cst_18 = arith.constant 8.000000e+00 : f32
    %29 = vector.broadcast %cst_18 : f32 to vector<1x128xf32>
    %30 = arith.divf %28, %29 : vector<1x128xf32>
    %31 = vector.broadcast %23 : vector<1x128xf32> to vector<8x128xf32>
    %32 = arith.subf %19, %31 : vector<8x128xf32>
    %cst_19 = arith.constant 9.99999974E-6 : f32
    %33 = vector.broadcast %cst_19 : f32 to vector<1x128xf32>
    %34 = arith.addf %30, %33 : vector<1x128xf32>
    %35 = math.rsqrt %34 : vector<1x128xf32>
    %36 = vector.broadcast %35 : vector<1x128xf32> to vector<8x128xf32>
    %37 = arith.mulf %32, %36 : vector<8x128xf32>
    %c0_20 = arith.constant 0 : index
    %c0_21 = arith.constant 0 : index
    %38 = vector.load %arg7[%c0_20, %c0_21] : memref<8x1xf32, #tpu.memory_space<vmem>>, vector<8x1xf32>
    %39 = vector.broadcast %38 : vector<8x1xf32> to vector<8x128xf32>
    %40 = arith.mulf %37, %39 : vector<8x128xf32>
    %c0_22 = arith.constant 0 : index
    %c0_23 = arith.constant 0 : index
    %41 = vector.load %arg8[%c0_22, %c0_23] : memref<8x1xf32, #tpu.memory_space<vmem>>, vector<8x1xf32>
    %42 = vector.broadcast %41 : vector<8x1xf32> to vector<8x128xf32>
    %43 = arith.addf %40, %42 : vector<8x128xf32>
    %c0_24 = arith.constant 0 : index
    %c0_25 = arith.constant 0 : index
    %44 = vector.load %arg9[%c0_24, %c0_25] : memref<32x8xf32, #tpu.memory_space<vmem>>, vector<32x8xf32>
    %cst_26 = arith.constant dense<0.000000e+00> : vector<32x128xf32>
    %45 = tpu.matmul %44, %43, %cst_26 {dimension_numbers = #tpu.dot_dimension_numbers<[1], [0], [0], [1], [0, 0, 1, 1], [], []>} : vector<32x8xf32>, vector<8x128xf32>, vector<32x128xf32> -> vector<32x128xf32>
    %c0_27 = arith.constant 0 : index
    %c0_28 = arith.constant 0 : index
    %46 = vector.load %arg10[%c0_27, %c0_28] : memref<32x1xf32, #tpu.memory_space<vmem>>, vector<32x1xf32>
    %47 = vector.broadcast %46 : vector<32x1xf32> to vector<32x128xf32>
    %48 = arith.addf %45, %47 : vector<32x128xf32>
    %cst_29 = arith.constant 0.000000e+00 : f32
    %49 = vector.broadcast %cst_29 : f32 to vector<32x128xf32>
    %50 = arith.maximumf %48, %49 : vector<32x128xf32>
    %c0_30 = arith.constant 0 : index
    %c0_31 = arith.constant 0 : index
    %51 = vector.load %arg11[%c0_30, %c0_31] : memref<8x32xf32, #tpu.memory_space<vmem>>, vector<8x32xf32>
    %cst_32 = arith.constant dense<0.000000e+00> : vector<8x128xf32>
    %52 = tpu.matmul %51, %50, %cst_32 {dimension_numbers = #tpu.dot_dimension_numbers<[1], [0], [0], [1], [0, 0, 1, 1], [], []>} : vector<8x32xf32>, vector<32x128xf32>, vector<8x128xf32> -> vector<8x128xf32>
    %c0_33 = arith.constant 0 : index
    %c0_34 = arith.constant 0 : index
    %53 = vector.load %arg12[%c0_33, %c0_34] : memref<8x1xf32, #tpu.memory_space<vmem>>, vector<8x1xf32>
    %54 = vector.broadcast %53 : vector<8x1xf32> to vector<8x128xf32>
    %55 = arith.addf %52, %54 : vector<8x128xf32>
    %56 = arith.addf %43, %55 : vector<8x128xf32>
    %cst_35 = arith.constant dense<0.000000e+00> : vector<128xf32>
    %57 = vector.multi_reduction <add>, %56, %cst_35 [0] : vector<8x128xf32> to vector<128xf32>
    %58 = vector.shape_cast %57 : vector<128xf32> to vector<1x128xf32>
    %cst_36 = arith.constant 8.000000e+00 : f32
    %59 = vector.broadcast %cst_36 : f32 to vector<1x128xf32>
    %60 = arith.divf %58, %59 : vector<1x128xf32>
    %61 = vector.broadcast %60 : vector<1x128xf32> to vector<8x128xf32>
    %62 = arith.subf %56, %61 : vector<8x128xf32>
    %63 = arith.mulf %62, %62 : vector<8x128xf32>
    %cst_37 = arith.constant dense<0.000000e+00> : vector<128xf32>
    %64 = vector.multi_reduction <add>, %63, %cst_37 [0] : vector<8x128xf32> to vector<128xf32>
    %65 = vector.shape_cast %64 : vector<128xf32> to vector<1x128xf32>
    %cst_38 = arith.constant 8.000000e+00 : f32
    %66 = vector.broadcast %cst_38 : f32 to vector<1x128xf32>
    %67 = arith.divf %65, %66 : vector<1x128xf32>
    %68 = vector.broadcast %60 : vector<1x128xf32> to vector<8x128xf32>
    %69 = arith.subf %56, %68 : vector<8x128xf32>
    %cst_39 = arith.constant 9.99999974E-6 : f32
    %70 = vector.broadcast %cst_39 : f32 to vector<1x128xf32>
    %71 = arith.addf %67, %70 : vector<1x128xf32>
    %72 = math.rsqrt %71 : vector<1x128xf32>
    %73 = vector.broadcast %72 : vector<1x128xf32> to vector<8x128xf32>
    %74 = arith.mulf %69, %73 : vector<8x128xf32>
    %c0_40 = arith.constant 0 : index
    %c0_41 = arith.constant 0 : index
    %75 = vector.load %arg13[%c0_40, %c0_41] : memref<8x1xf32, #tpu.memory_space<vmem>>, vector<8x1xf32>
    %76 = vector.broadcast %75 : vector<8x1xf32> to vector<8x128xf32>
    %77 = arith.mulf %74, %76 : vector<8x128xf32>
    %cst_42 = arith.constant dense<0.000000e+00> : vector<128xf32>
    %78 = vector.multi_reduction <add>, %77, %cst_42 [0] : vector<8x128xf32> to vector<128xf32>
    %79 = vector.shape_cast %78 : vector<128xf32> to vector<1x128xf32>
    %c0_43 = arith.constant 0 : index
    %c0_44 = arith.constant 0 : index
    %80 = vector.load %arg14[%c0_43, %c0_44] : memref<1x1xf32, #tpu.memory_space<vmem>>, vector<1x1xf32>
    %81 = vector.broadcast %80 : vector<1x1xf32> to vector<1x128xf32>
    %82 = arith.addf %79, %81 : vector<1x128xf32>
    %c0_45 = arith.constant 0 : index
    %c0_46 = arith.constant 0 : index
    %83 = vector.load %arg15[%c0_45, %c0_46] : memref<1x128xf32, #tpu.memory_space<vmem>>, vector<1x128xf32>
    tpu.vector_store %arg15[%c0_45, %c0_46], %82 {strides = array<i32>} : memref<1x128xf32, #tpu.memory_space<vmem>>, vector<1x128xf32>,
    return
  }
  func.func @transform_0(%arg0: i32) -> (i32, i32) {
    %c0_i32 = arith.constant 0 : i32
    %c0_i32_0 = arith.constant 0 : i32
    return %arg0, %c0_i32 : i32, i32
  }
  func.func @transform_1(%arg0: i32) -> (i32, i32) {
    %c0_i32 = arith.constant 0 : i32
    %c0_i32_0 = arith.constant 0 : i32
    %c0_i32_1 = arith.constant 0 : i32
    return %c0_i32, %c0_i32_0 : i32, i32
  }
  func.func @transform_2(%arg0: i32) -> (i32, i32) {
    %c0_i32 = arith.constant 0 : i32
    %c0_i32_0 = arith.constant 0 : i32
    %c0_i32_1 = arith.constant 0 : i32
    return %c0_i32, %c0_i32_0 : i32, i32
  }
  func.func @transform_3(%arg0: i32) -> (i32, i32) {
    %c0_i32 = arith.constant 0 : i32
    %c0_i32_0 = arith.constant 0 : i32
    %c0_i32_1 = arith.constant 0 : i32
    return %c0_i32, %c0_i32_0 : i32, i32
  }
  func.func @transform_4(%arg0: i32) -> (i32, i32) {
    %c0_i32 = arith.constant 0 : i32
    %c0_i32_0 = arith.constant 0 : i32
    %c0_i32_1 = arith.constant 0 : i32
    return %c0_i32, %c0_i32_0 : i32, i32
  }
  func.func @transform_5(%arg0: i32) -> (i32, i32) {
    %c0_i32 = arith.constant 0 : i32
    %c0_i32_0 = arith.constant 0 : i32
    %c0_i32_1 = arith.constant 0 : i32
    return %c0_i32, %c0_i32_0 : i32, i32
  }
  func.func @transform_6(%arg0: i32) -> (i32, i32) {
    %c0_i32 = arith.constant 0 : i32
    %c0_i32_0 = arith.constant 0 : i32
    %c0_i32_1 = arith.constant 0 : i32
    return %c0_i32, %c0_i32_0 : i32, i32
  }
  func.func @transform_7(%arg0: i32) -> (i32, i32) {
    %c0_i32 = arith.constant 0 : i32
    %c0_i32_0 = arith.constant 0 : i32
    %c0_i32_1 = arith.constant 0 : i32
    return %c0_i32, %c0_i32_0 : i32, i32
  }
  func.func @transform_8(%arg0: i32) -> (i32, i32) {
    %c0_i32 = arith.constant 0 : i32
    %c0_i32_0 = arith.constant 0 : i32
    %c0_i32_1 = arith.constant 0 : i32
    return %c0_i32, %c0_i32_0 : i32, i32
  }
  func.func @transform_9(%arg0: i32) -> (i32, i32) {
    %c0_i32 = arith.constant 0 : i32
    %c0_i32_0 = arith.constant 0 : i32
    %c0_i32_1 = arith.constant 0 : i32
    return %c0_i32, %c0_i32_0 : i32, i32
  }
  func.func @transform_10(%arg0: i32) -> (i32, i32) {
    %c0_i32 = arith.constant 0 : i32
    %c0_i32_0 = arith.constant 0 : i32
    %c0_i32_1 = arith.constant 0 : i32
    return %c0_i32, %c0_i32_0 : i32, i32
  }
  func.func @transform_11(%arg0: i32) -> (i32, i32) {
    %c0_i32 = arith.constant 0 : i32
    %c0_i32_0 = arith.constant 0 : i32
    %c0_i32_1 = arith.constant 0 : i32
    return %c0_i32, %c0_i32_0 : i32, i32
  }
  func.func @transform_12(%arg0: i32) -> (i32, i32) {
    %c0_i32 = arith.constant 0 : i32
    %c0_i32_0 = arith.constant 0 : i32
    %c0_i32_1 = arith.constant 0 : i32
    return %c0_i32, %c0_i32_0 : i32, i32
  }
  func.func @transform_13(%arg0: i32) -> (i32, i32) {
    %c0_i32 = arith.constant 0 : i32
    %c0_i32_0 = arith.constant 0 : i32
    %c0_i32_1 = arith.constant 0 : i32
    return %c0_i32, %c0_i32_0 : i32, i32
  }
  func.func @transform_14(%arg0: i32) -> (i32, i32) {
    %c0_i32 = arith.constant 0 : i32
    %c0_i32_0 = arith.constant 0 : i32
    return %c0_i32, %arg0 : i32, i32
  }
  func.func @transform_15(%arg0: i32) -> (i32, i32) {
    %c0_i32 = arith.constant 0 : i32
    %c0_i32_0 = arith.constant 0 : i32
    return %arg0, %c0_i32 : i32, i32
  }
}

</mosaic_0001>

<bundles_post_ra>
// kernel: net_forward.1
= control target key start
LH: loop header
LB: loop body
LE: loop exit
PB: predicated region body
PF: predicated region fallthrough
CT: control target
= control target key end

     0   :  { %vm74_vm0 = vcmask 130048   ;;  %v504_v5 = vmov 0   ;;  %vm150_vm1 = vcmask 64512   ;;  %v505_v47 = vmov 8.0   ;;  %s803_s0 = inlined_call_operand.vmem [shape: f32[128,16], index: 0, kind: input, shape index: {}]   ;;  %s804_s2 = inlined_call_operand.vmem [shape: f32[8,1], index: 2, kind: input, shape index: {}]   ;;  %s805_s5 = inlined_call_operand.vmem [shape: f32[8,1], index: 5, kind: input, shape index: {}]   ;;  %s806_s9 = inlined_call_operand.vmem [shape: f32[32,1], index: 9, kind: input, shape index: {}]   ;;  %s807_s4 = inlined_call_operand.vmem [shape: f32[16,1], index: 4, kind: input, shape index: {}]   ;;  %s808_s12 = inlined_call_operand.vmem [shape: f32[8,1], index: 12, kind: input, shape index: {}]   ;;  %s809_s1 = inlined_call_operand.vmem [shape: f32[8,16], index: 1, kind: input, shape index: {}]   ;;  %s810_s6 = inlined_call_operand.vmem [shape: f32[8,1], index: 6, kind: input, shape index: {}]   ;;  %s811_s7 = inlined_call_operand.vmem [shape: f32[8,1], index: 7, kind: input, shape index: {}]   ;;  %s812_s13 = inlined_call_operand.<no memory space> [shape: f32[1,1], index: 13, kind: input, shape index: {}]   ;;  %s813_s3 = inlined_call_operand.vmem [shape: f32[24,8], index: 3, kind: input, shape index: {}]   ;;  %s814_s11 = inlined_call_operand.vmem [shape: f32[8,1], index: 11, kind: input, shape index: {}]   ;;  %s815_s8 = inlined_call_operand.vmem [shape: f32[32,8], index: 8, kind: input, shape index: {}]   ;;  %s816_s15 = inlined_call_operand.vmem [shape: f32[128,16], index: 15, kind: output, shape index: {1}]   ;;  %s817_s10 = inlined_call_operand.vmem [shape: f32[8,32], index: 10, kind: input, shape index: {}]   ;;  %s818_s14 = inlined_call_operand.vmem [shape: f32[1,128], index: 14, kind: output, shape index: {0}]  }
   0x1   :  { %v66_v0 = vld [vmem:[%s803_s0 + $0x78] sm:$0xff]  ;;  %v65_v1 = vld [vmem:[%s803_s0 + $0x70] sm:$0xff]  ;;  %v64_v2 = vld [vmem:[%s803_s0 + $0x68] sm:$0xff]  ;;  %495 = vset.pattern.permute.xlu0 %v504_v5  ;;  %496 = vset.pattern.permute.xlu1 %v504_v5  ;;  %v21_v28 = vstv %s812_s13  ;;  %498 = vrcp.f32 %v505_v47  ;;  %vm384_vm6 = vcmask 261120  }
   0x2   :  { %467 = vmatpush.xpose.msk.msra.mxu0 %vm74_vm0, %v66_v0  ;;  %v68_v3 = vld [vmem:[%s804_s2] sm:$0xff]  ;;  %497 = vset.pattern.permute.xlu2 %v504_v5  ;;  %v62_v6 = vld [vmem:[%s803_s0 + $0x58] sm:$0xff]  ;;  %v61_v8 = vld [vmem:[%s803_s0 + $0x50] sm:$0xff]  ;;  %22 = vst [vmem:[#allocation2] sm:$0x1] %v21_v28 }
   0x3   :  { %v63_v4 = vld [vmem:[%s803_s0 + $0x60] sm:$0xff]  ;;  %71 = vperm.xlu0 %495, %v68_v3   ;;  %v60_v9 = vld [vmem:[%s803_s0 + $0x48] sm:$0xff]  ;;  %v58_v12 = vld [vmem:[%s803_s0 + $0x38] sm:$0xff] }
   0x4   :  { %v248_v7 = vld [vmem:[%s805_s5] sm:$0xff]  ;;  %v309_v10 = vld [vmem:[%s806_s9 + $0x8] sm:$0xff]  ;;  %v57_v14 = vld [vmem:[%s803_s0 + $0x30] sm:$0xff] }
   0x5   :  { %v59_v11 = vld [vmem:[%s803_s0 + $0x40] sm:$0xff]  ;;  %v56_v15 = vld [vmem:[%s803_s0 + $0x28] sm:$0xff]  ;;  %v54_v18 = vld [vmem:[%s803_s0 + $0x18] sm:$0xff] }
   0x6   :  { %468 = vmatpush.xpose.msk.msra.mxu0 %vm74_vm0, %v65_v1  ;;  %v186_v13 = vld [vmem:[%s807_s4] sm:$0xff]  ;;  %v53_v19 = vld [vmem:[%s803_s0 + $0x10] sm:$0xff]  ;;  %v52_v20 = vld [vmem:[%s803_s0 + $0x8] sm:$0xff] }
   0x7   :  { %v437_v16 = vld [vmem:[%s808_s12] sm:$0xff]  ;;  %v187_v26 = vld [vmem:[%s807_s4 + $0x8] sm:$0xff]  ;;  %v311_v27 = vld [vmem:[%s806_s9 + $0x18] sm:$0xff]  ;;  %v499_v50 = vpop.eup %498 }
   0x8   :  { %v55_v17 = vld [vmem:[%s803_s0 + $0x20] sm:$0xff]  ;;  %329 = vperm.xlu2 %497, %v311_v27   ;;  %v310_v29 = vld [vmem:[%s806_s9 + $0x10] sm:$0xff]  ;;  %v148_v37 = vld [vmem:[%s813_s3 + $0x8] sm:$0xff]  ;;  %v262_v52 = vmul.f32 8.0, %v499_v50  ;;  %vm266_vm2 = vweird.f32 %v499_v50 }
   0x9   :  { %v51_v21 = vld [vmem:[%s803_s0] sm:$0xff]  ;;  %v149_v38 = vld [vmem:[%s813_s3 + $0x10] sm:$0xff] }
   0xa   :  { %469 = vmatpush.xpose.msk.msra.mxu0 %vm74_vm0, %v64_v2  ;;  %v67_v22 = vld [vmem:[%s809_s1] sm:$0xff]  ;;  %v263_v54 = vsub.f32 1.0, %v262_v52 }
   0xb   :  { %251 = vperm.xlu0 %495, %v248_v7   ;;  %v290_v23 = vld [vmem:[%s810_s6] sm:$0xff] }
   0xc   :  { %293 = vperm.xlu1 %496, %v290_v23   ;;  %v297_v24 = vld [vmem:[%s811_s7] sm:$0xff]  ;;  %v264_v57 = vmul.f32 %v499_v50, %v263_v54  ;;  %v305_v23 = vld [vmem:[%s815_s8 + $0x8] sm:$0xff] }
   0xd   :  { %v308_v25 = vld [vmem:[%s806_s9] sm:$0xff] }
   0xe   :  { %470 = vmatpush.xpose.msk.msra.mxu0 %vm74_vm0, %v63_v4  ;;  %v450_v30 = vld [vmem:[#allocation2] sm:$0x1]  ;;  %v265_v60 = vadd.f32 %v499_v50, %v264_v57 }
   0xf   :  { %v147_v35 = vld [vmem:[%s813_s3] sm:$0xff] }
  0x10   :  { %324 = vperm.xlu2 %497, %v310_v29   ;;  %v378_v36 = vld [vmem:[%s814_s11] sm:$0xff]  ;;  %v709_v63 = vsel %vm266_vm2, %v499_v50, %v265_v60 }
  0x11   :  { %v377_v47 = vld [vmem:[%s817_s10] sm:$0xff] }
  0x12   :  { %471 = vmatpush.xpose.msk.msra.mxu0 %vm74_vm0, %v62_v6 }
  0x13   :  { %319 = vperm.xlu0 %495, %v309_v10  }
  0x14   :  { %300 = vperm.xlu1 %496, %v297_v24   ;;  %v306_v24 = vld [vmem:[%s815_s8 + $0x10] sm:$0xff] }
  0x16   :  { %472 = vmatpush.xpose.msk.msra.mxu0 %vm74_vm0, %v61_v8 }
  0x18   :  { %381 = vperm.xlu2 %497, %v378_v36  }
  0x1a   :  { %473 = vmatpush.xpose.msk.msra.mxu0 %vm74_vm0, %v60_v9 }
  0x1b   :  { %190 = vperm.xlu0 %495, %v186_v13  }
  0x1c   :  { %314 = vperm.xlu1 %496, %v308_v25   ;;  %v307_v25 = vld [vmem:[%s815_s8 + $0x18] sm:$0xff] }
  0x1e   :  { %474 = vmatpush.xpose.msk.msra.mxu0 %vm74_vm0, %v59_v11 }
  0x22   :  { %475 = vmatpush.xpose.msk.msra.mxu0 %vm74_vm0, %v58_v12 }
  0x23   :  { %440 = vperm.xlu0 %495, %v437_v16  }
  0x24   :  { %195 = vperm.xlu1 %496, %v187_v26  }
  0x26   :  { %476 = vmatpush.xpose.msk.msra.mxu0 %vm74_vm0, %v57_v14 }
  0x2a   :  { %477 = vmatpush.xpose.msk.msra.mxu0 %vm74_vm0, %v56_v15 }
  0x2c   :  { %453 = vperm.xlu1 %496, %v450_v30  }
  0x2e   :  { %478 = vmatpush.xpose.msk.msra.mxu0 %vm74_vm0, %v55_v17 }
  0x32   :  { %479 = vmatpush.xpose.msk.msra.mxu0 %vm74_vm0, %v54_v18 }
  0x36   :  { %480 = vmatpush.xpose.msk.msra.mxu0 %vm74_vm0, %v53_v19 }
  0x3a   :  { %481 = vmatpush.xpose.msk.msra.mxu0 %vm74_vm0, %v52_v20 }
  0x3e   :  { %482 = vmatpush.xpose.msk.msra.mxu0 %vm74_vm0, %v51_v21 }
  0x41   :  { %483 = vmatmul.msk.f32.vlgmr.msra.gmra.mxu0 %vm74_vm0, %v67_v22  ;;  %v304_v22 = vld [vmem:[%s815_s8] sm:$0xff] }
  0x62   :  { %v330_v26 = vpop.permute.xlu2 %329 }
  0x6a   :  { %v325_v27 = vpop.permute.xlu2 %324 }
  0x72   :  { %v382_v28 = vpop.permute.xlu2 %381 }
  0x75   :  { %v72_v31 = vpop.permute.xlu0 %71 }
  0x7d   :  { %v252_v40 = vpop.permute.xlu0 %251 }
  0x7e   :  { %v294_v39 = vpop.permute.xlu1 %293 }
  0x85   :  { %v705_v42 = vpop.permute.xlu0 %319 }
  0x86   :  { %v301_v41 = vpop.permute.xlu1 %300 }
  0x8d   :  { %v191_v44 = vpop.permute.xlu0 %190 }
  0x8e   :  { %v707_v43 = vpop.permute.xlu1 %314 }
  0x96   :  { %v196_v48 = vpop.permute.xlu1 %195 }
  0xbe   :  { %v143_v32 = vpop.f32.mrf.mxu0 }
  0xbf   :  { %v144_v33 = vadd.f32 %v143_v32, %v72_v31 }
  0xc1   :  { %v146_v34 = vmax.f32 %v144_v33, 0.0 }
  0xc3   :  { %175 = vmatpush.msra.mxu1 %v146_v34 }
  0xc4   :  { %484 = vmatmul.msk.f32.vlgmr.msra.gmra.mxu1 %vm150_vm1, %v147_v35 }
  0xcc   :  { %485 = vmatmul.msk.f32.gmra.mxu1 %vm150_vm1, %v148_v37 }
  0xd4   :  { %486 = vmatmul.msk.f32.gmra.mxu1 %vm150_vm1, %v149_v38 }
 0x141   :  { %v177_v45 = vpop.f32.mrf.mxu1 }
 0x142   :  { %v198_v46 = vadd.f32 %v191_v44, %v177_v45 }
 0x144   :  { %200 = vxpose.xlu2.b32.start [1/2] (short) %v198_v46, 128 }
 0x149   :  { %v180_v49 = vpop.f32.mrf.mxu1 }
 0x14a   :  { %v199_v51 = vadd.f32 %v196_v48, %v180_v49 }
 0x14c   :  { %201 = vxpose.xlu2.b32.end [2/2] (short) %v199_v51, 128 }
 0x151   :  { %v183_v53 = vpop.f32.mrf.mxu1 }
 0x152   :  { %v254_v55 = vadd.f32 %v252_v40, %v183_v53 }
 0x154   :  { %v255_v56 = vrot.slane %v254_v55, 4 }
 0x156   :  { %v256_v58 = vadd.f32 %v255_v56, %v254_v55 }
 0x158   :  { %v257_v59 = vrot.slane %v256_v58, 2 }
 0x15a   :  { %v258_v61 = vadd.f32 %v257_v59, %v256_v58 }
 0x15c   :  { %v259_v62 = vrot.slane %v258_v61, 1 }
 0x15e   :  { %v260_v0 = vadd.f32 %v259_v62, %v258_v61 }
 0x160   :  { %v268_v1 = vmul.f32 %v709_v63, %v260_v0 }
 0x162   :  { %v269_v2 = vsub.f32 %v254_v55, %v268_v1 }
 0x164   :  { %v270_v3 = vmul.f32 %v269_v2, %v269_v2 }
 0x166   :  { %v271_v4 = vrot.slane %v270_v3, 4 }
 0x168   :  { %v272_v5 = vadd.f32 %v271_v4, %v270_v3 }
 0x16a   :  { %v273_v6 = vrot.slane %v272_v5, 2 }
 0x16c   :  { %v274_v7 = vadd.f32 %v273_v6, %v272_v5 }
 0x16e   :  { %v275_v8 = vrot.slane %v274_v7, 1 }
 0x170   :  { %v276_v9 = vadd.f32 %v275_v8, %v274_v7 }
 0x172   :  { %v277_v10 = vmul.f32 %v276_v9, %v709_v63 }
 0x174   :  { %v278_v11 = vadd.f32 1e-05, %v277_v10 }
 0x176   :  { %500 = vrsqrt.f32 %v278_v11  ;;  %vm285_vm4 = vweird.f32 %v278_v11 }
 0x17c   :  { %v501_v12 = vpop.eup %500 }
 0x17d   :  { %v280_v13 = vmul.f32 %v501_v12, %v278_v11  ;;  %vm286_vm3 = vweird.f32 %v501_v12 }
 0x17e   :  { %vm287_vm5 = vmor %vm285_vm4, %vm286_vm3 }
 0x17f   :  { %v281_v14 = vmul.f32 %v501_v12, %v280_v13 }
 0x181   :  { %v282_v15 = vmul.f32 0.5, %v281_v14 }
 0x183   :  { %v283_v16 = vsub.f32 1.5, %v282_v15 }
 0x185   :  { %v284_v17 = vmul.f32 %v501_v12, %v283_v16 }
 0x187   :  { %v288_v18 = vsel %vm287_vm5, %v501_v12, %v284_v17 }
 0x188   :  { %v289_v19 = vmul.f32 %v288_v18, %v269_v2 }
 0x18a   :  { %v296_v20 = vmul.f32 %v294_v39, %v289_v19 }
 0x18c   :  { %v303_v21 = vadd.f32 %v301_v41, %v296_v20 }
 0x18e   :  { %359 = vmatpush.msra.mxu2 %v303_v21 }
 0x18f   :  { %487 = vmatmul.msk.f32.vlgmr.msra.gmra.mxu2 %vm150_vm1, %v304_v22  ;;  %v441_v22 = vpop.permute.xlu0 %440 }
 0x197   :  { %488 = vmatmul.msk.f32.gmra.mxu2 %vm150_vm1, %v305_v23 }
 0x19f   :  { %489 = vmatmul.msk.f32.gmra.mxu2 %vm150_vm1, %v306_v24 }
 0x1a7   :  { %490 = vmatmul.msk.f32.gmra.mxu2 %vm150_vm1, %v307_v25 }
 0x1dd   :  { %v216_v30 = vpop.trf.xlu2 }
 0x1de   :  { %232 = vst.msk [vmem:[%s816_s15] sm:$0xff] %vm74_vm0, %v216_v30 }
 0x1e5   :  { %v217_v32 = vpop.trf.xlu2 }
 0x1e6   :  { %233 = vst.msk [vmem:[%s816_s15 + $0x8] sm:$0xff] %vm74_vm0, %v217_v32 }
 0x1ed   :  { %v218_v34 = vpop.trf.xlu2 }
 0x1ee   :  { %234 = vst.msk [vmem:[%s816_s15 + $0x10] sm:$0xff] %vm74_vm0, %v218_v34 }
 0x1f5   :  { %v219_v40 = vpop.trf.xlu2 }
 0x1f6   :  { %235 = vst.msk [vmem:[%s816_s15 + $0x18] sm:$0xff] %vm74_vm0, %v219_v40 }
 0x212   :  { %v361_v29 = vpop.f32.mrf.mxu2 }
 0x213   :  { %v362_v41 = vadd.f32 %v361_v29, %v707_v43 }
 0x215   :  { %v373_v46 = vmax.f32 %v362_v41, 0.0 }
 0x21a   :  { %v364_v31 = vpop.f32.mrf.mxu2 }
 0x21b   :  { %v365_v38 = vadd.f32 %v364_v31, %v705_v42  ;;  %v220_v42 = vpop.trf.xlu2 }
 0x21c   :  { %236 = vst.msk [vmem:[%s816_s15 + $0x20] sm:$0xff] %vm74_vm0, %v220_v42 }
 0x21d   :  { %v374_v45 = vmax.f32 %v365_v38, 0.0 }
 0x222   :  { %v367_v33 = vpop.f32.mrf.mxu2 }
 0x223   :  { %v368_v36 = vadd.f32 %v367_v33, %v325_v27  ;;  %v221_v43 = vpop.trf.xlu2 }
 0x224   :  { %237 = vst.msk [vmem:[%s816_s15 + $0x28] sm:$0xff] %vm74_vm0, %v221_v43 }
 0x225   :  { %v375_v44 = vmax.f32 %v368_v36, 0.0 }
 0x22a   :  { %v370_v35 = vpop.f32.mrf.mxu2 }
 0x22b   :  { %v371_v37 = vadd.f32 %v370_v35, %v330_v26  ;;  %v222_v48 = vpop.trf.xlu2 }
 0x22c   :  { %238 = vst.msk [vmem:[%s816_s15 + $0x30] sm:$0xff] %vm74_vm0, %v222_v48 }
 0x22d   :  { %v376_v39 = vmax.f32 %v371_v37, 0.0 }
 0x22f   :  { %400 = vmatpush.msra.mxu3 %v376_v39 }
 0x231   :  { %401 = vmatpush.msra.mxu3 %v375_v44 }
 0x233   :  { %402 = vmatpush.msra.mxu3 %v374_v45  ;;  %v223_v49 = vpop.trf.xlu2 }
 0x234   :  { %239 = vst.msk [vmem:[%s816_s15 + $0x38] sm:$0xff] %vm74_vm0, %v223_v49 }
 0x235   :  { %403 = vmatpush.msra.mxu3 %v373_v46 }
 0x236   :  { %491 = vmatmul.msk.f32.vlgmr.msra.gmra.mxu3 %vm384_vm6, %v377_v47 }
 0x23b   :  { %v224_v50 = vpop.trf.xlu2 }
 0x23c   :  { %240 = vst.msk [vmem:[%s816_s15 + $0x40] sm:$0xff] %vm74_vm0, %v224_v50 }
 0x243   :  { %v225_v51 = vpop.trf.xlu2 }
 0x244   :  { %241 = vst.msk [vmem:[%s816_s15 + $0x48] sm:$0xff] %vm74_vm0, %v225_v51 }
 0x24b   :  { %v226_v54 = vpop.trf.xlu2 }
 0x24c   :  { %242 = vst.msk [vmem:[%s816_s15 + $0x50] sm:$0xff] %vm74_vm0, %v226_v54 }
 0x253   :  { %v227_v59 = vpop.trf.xlu2 }
 0x254   :  { %243 = vst.msk [vmem:[%s816_s15 + $0x58] sm:$0xff] %vm74_vm0, %v227_v59 }
 0x25b   :  { %v228_v1 = vpop.trf.xlu2 }
 0x25c   :  { %244 = vst.msk [vmem:[%s816_s15 + $0x60] sm:$0xff] %vm74_vm0, %v228_v1 }
 0x263   :  { %v229_v6 = vpop.trf.xlu2 }
 0x264   :  { %245 = vst.msk [vmem:[%s816_s15 + $0x68] sm:$0xff] %vm74_vm0, %v229_v6 }
 0x26b   :  { %v230_v11 = vpop.trf.xlu2 }
 0x26c   :  { %246 = vst.msk [vmem:[%s816_s15 + $0x70] sm:$0xff] %vm74_vm0, %v230_v11 }
 0x273   :  { %v231_v14 = vpop.trf.xlu2 }
 0x274   :  { %247 = vst.msk [vmem:[%s816_s15 + $0x78] sm:$0xff] %vm74_vm0, %v231_v14 }
 0x2b9   :  { %v405_v52 = vpop.f32.mrf.mxu3 }
 0x2ba   :  { %v406_v53 = vadd.f32 %v405_v52, %v382_v28  ;;  %v454_v28 = vpop.permute.xlu1 %453 }
 0x2bb   :  { %v456_v30 = vperm.slane %v454_v28, 0 }
 0x2bc   :  { %v408_v55 = vadd.f32 %v406_v53, %v303_v21 }
 0x2be   :  { %v409_v56 = vrot.slane %v408_v55, 4 }
 0x2c0   :  { %v410_v57 = vadd.f32 %v409_v56, %v408_v55 }
 0x2c2   :  { %v411_v58 = vrot.slane %v410_v57, 2 }
 0x2c4   :  { %v412_v60 = vadd.f32 %v411_v58, %v410_v57 }
 0x2c6   :  { %v413_v61 = vrot.slane %v412_v60, 1 }
 0x2c8   :  { %v414_v62 = vadd.f32 %v413_v61, %v412_v60 }
 0x2ca   :  { %v415_v0 = vmul.f32 %v414_v62, %v709_v63 }
 0x2cc   :  { %v416_v2 = vsub.f32 %v408_v55, %v415_v0 }
 0x2ce   :  { %v417_v3 = vmul.f32 %v416_v2, %v416_v2 }
 0x2d0   :  { %v418_v4 = vrot.slane %v417_v3, 4 }
 0x2d2   :  { %v419_v5 = vadd.f32 %v418_v4, %v417_v3 }
 0x2d4   :  { %v420_v7 = vrot.slane %v419_v5, 2 }
 0x2d6   :  { %v421_v8 = vadd.f32 %v420_v7, %v419_v5 }
 0x2d8   :  { %v422_v9 = vrot.slane %v421_v8, 1 }
 0x2da   :  { %v423_v10 = vadd.f32 %v422_v9, %v421_v8 }
 0x2dc   :  { %v424_v12 = vmul.f32 %v423_v10, %v709_v63 }
 0x2de   :  { %v425_v13 = vadd.f32 1e-05, %v424_v12 }
 0x2e0   :  { %502 = vrsqrt.f32 %v425_v13  ;;  %vm432_vm8 = vweird.f32 %v425_v13 }
 0x2e6   :  { %v503_v15 = vpop.eup %502 }
 0x2e7   :  { %v427_v16 = vmul.f32 %v503_v15, %v425_v13  ;;  %vm433_vm7 = vweird.f32 %v503_v15 }
 0x2e8   :  { %vm434_vm9 = vmor %vm432_vm8, %vm433_vm7 }
 0x2e9   :  { %v428_v17 = vmul.f32 %v503_v15, %v427_v16 }
 0x2eb   :  { %v429_v18 = vmul.f32 0.5, %v428_v17 }
 0x2ed   :  { %v430_v19 = vsub.f32 1.5, %v429_v18 }
 0x2ef   :  { %v431_v63 = vmul.f32 %v503_v15, %v430_v19 }
 0x2f1   :  { %v435_v20 = vsel %vm434_vm9, %v503_v15, %v431_v63 }
 0x2f2   :  { %v436_v21 = vmul.f32 %v435_v20, %v416_v2 }
 0x2f4   :  { %v443_v23 = vmul.f32 %v441_v22, %v436_v21 }
 0x2f6   :  { %v444_v24 = vrot.slane %v443_v23, 4 }
 0x2f8   :  { %v445_v25 = vadd.f32 %v444_v24, %v443_v23 }
 0x2fa   :  { %v446_v26 = vrot.slane %v445_v25, 2 }
 0x2fc   :  { %v447_v27 = vadd.f32 %v446_v26, %v445_v25 }
 0x2fe   :  { %v448_v29 = vrot.slane %v447_v27, 1 }
 0x300   :  { %v449_v31 = vadd.f32 %v448_v29, %v447_v27 }
 0x302   :  { %v457_v32 = vadd.f32 %v456_v30, %v449_v31 }
 0x304   :  { %458 = vst [vmem:[%s818_s14] sm:$0x1] %v457_v32 }

</bundles_post_ra>
